<compile_context>
chip_gen: v7x
topology: tpu7x:2x2x1
jax: 0.10.0
libtpu: 0.0.40
codegen_flags: <defaults>
</compile_context>

<pallas_src>
import functools

import jax
import jax.numpy as jnp
from jax import lax
from jax.experimental import pallas as pl
from jax.experimental.pallas import tpu as pltpu


def _bce_loss_kernel(x_ref, t_ref, m_ref, o_ref, acc_ref, *,
                     n_items, mask_cols, lane_accum):
    j = pl.program_id(1)

    @pl.when(j == 0)
    def _():
        acc_ref[...] = jnp.zeros_like(acc_ref)

    # Match the module's .float() calls: compute in f32 regardless of input dtype.
    x = x_ref[...].astype(jnp.float32)   # logits      (TB, TN)
    z = t_ref[...].astype(jnp.float32)   # targets     (TB, TN)
    w = m_ref[...].astype(jnp.float32)   # weight/mask (TB, TN)

    if mask_cols:
        # Zero all three streams on padded item columns BEFORE the exp/log
        # path: padded garbage can never produce inf/NaN, and the loss there
        # is exactly 0 (max(0,0) - 0 + log1p(1)) * 0.
        tb, tn = x.shape
        col = j * tn + lax.broadcasted_iota(jnp.int32, (tb, tn), 1)
        valid = col < n_items
        x = jnp.where(valid, x, 0.0)
        z = jnp.where(valid, z, 0.0)
        w = jnp.where(valid, w, 0.0)

    # Numerically-stable BCE-with-logits (PyTorch formula), per-element weight.
    loss = (jnp.maximum(x, 0.0) - x * z + jnp.log1p(jnp.exp(-jnp.abs(x)))) * w

    if lane_accum:
        # Lane-wise partials: fold 128-lane column chunks with VALU adds only
        # (lane-aligned static slices = pure vreg selection, no relayout).
        tb, tn = loss.shape
        part = loss[:, 0:128]
        for k in range(1, tn // 128):
            part = part + loss[:, k * 128:(k + 1) * 128]
        acc_ref[...] += part                                   # (TB, 128)
    else:
        # TN not a multiple of 128 (only when TN == N, small N): plain reduce.
        acc_ref[...] += jnp.sum(loss, axis=1, keepdims=True)   # (TB, 1)

    @pl.when(j == pl.num_programs(1) - 1)
    def _():
        if lane_accum:
            row_sum = jnp.sum(acc_ref[...], axis=1, keepdims=True)  # 1 XLU reduce / row block
        else:
            row_sum = acc_ref[...]
        row_mean = row_sum * (1.0 / n_items)                        # divide by the TRUE N
        o_ref[...] = jnp.broadcast_to(row_mean, o_ref.shape)        # lane-dense unmasked vst


def _sublane_multiple(dtype) -> int:
    # f32 -> 8, bf16 -> 16, int8/bool -> 32 (packed-tile sublane minima).
    itemsize = jnp.dtype(dtype).itemsize
    return max(8, 8 * (4 // max(1, itemsize)))


def _round_up(x: int, m: int) -> int:
    return ((x + m - 1) // m) * m


def _vmem_capacity_bytes(default: int = 64 << 20) -> int:
    try:
        info = pltpu.get_tpu_info()
        return int(getattr(info, "vmem_capacity_bytes", default))
    except Exception:
        return default


def binary_cross_entropy_loss(inputs, targets, mask, *, tb_max=256, tn_max=4096):
    """Pallas equivalent of BinaryCrossEntropyLoss.forward -> (B,) float32.

    Inputs may be any dtypes (f32, bf16, int8/bool, ...); the kernel upcasts to
    f32 internally.  Feeding bf16 logits and int8 targets/mask cuts streamed
    HBM bytes ~3x on this memory-bound kernel.
    """
    B, N = inputs.shape
    assert targets.shape == (B, N) and mask.shape == (B, N)

    row_mult = max(_sublane_multiple(a.dtype) for a in (inputs, targets, mask))
    elem_bytes = sum(a.dtype.itemsize for a in (inputs, targets, mask))

    # ---- batch tile: keep >= 2 batch tiles whenever legally possible so the
    # second TensorCore (v7x megacore) always gets work. --------------------
    if B < 2 * row_mult:
        TB = B                                              # full dim: always legal
    else:
        cap = max(row_mult, (min(tb_max, B) // row_mult) * row_mult)
        TB = min(cap, _round_up(pl.cdiv(B, 2), row_mult))   # -> grid(0) >= 2

    # ---- item tile: multiple of 128; prefer one that divides N (lets the
    # kernel statically drop the remainder-column mask). --------------------
    tn_cap = max(128, (tn_max // 128) * 128)
    if N <= tn_cap:
        TN = N                                              # full dim
    else:
        TN = tn_cap
        for cand in range(tn_cap, tn_cap // 2 - 1, -128):
            if N % cand == 0:
                TN = cand
                break

    # ---- VMEM budget: double-buffered input blocks + out blocks + scratch,
    # capped well inside v7x's 64 MiB physical per-TC VMEM. ------------------
    budget = min(40 << 20, int(0.6 * _vmem_capacity_bytes()))
    fixed = 2 * TB * 128 * 4 + TB * 128 * 4                 # out (x2 buffers) + scratch
    max_tn_fit = max(128, (((budget - fixed) // (2 * TB * elem_bytes)) // 128) * 128)
    if TN > max_tn_fit:
        TN = max_tn_fit

    mask_cols = (N % TN) != 0
    lane_accum = (TN % 128) == 0
    acc_lanes = 128 if lane_accum else 1

    grid = (pl.cdiv(B, TB), pl.cdiv(N, TN))

    needed = 2 * TB * TN * elem_bytes + 2 * TB * 128 * 4 + TB * acc_lanes * 4
    vmem_limit = int(min(max(needed + (4 << 20), 16 << 20), 48 << 20))

    kernel = functools.partial(_bce_loss_kernel, n_items=N,
                               mask_cols=mask_cols, lane_accum=lane_accum)

    in_bytes = sum(int(a.size) * a.dtype.itemsize for a in (inputs, targets, mask))
    cost = pl.CostEstimate(
        flops=9 * B * N,
        transcendentals=2 * B * N,
        bytes_accessed=int(in_bytes) + B * 128 * 4,
    )

    out = pl.pallas_call(
        kernel,
        out_shape=jax.ShapeDtypeStruct((B, 128), jnp.float32),
        grid=grid,
        in_specs=[
            pl.BlockSpec((TB, TN), lambda i, j: (i, j)),
            pl.BlockSpec((TB, TN), lambda i, j: (i, j)),
            pl.BlockSpec((TB, TN), lambda i, j: (i, j)),
        ],
        out_specs=pl.BlockSpec((TB, 128), lambda i, j: (i, 0)),
        scratch_shapes=[pltpu.VMEM((TB, acc_lanes), jnp.float32)],
        compiler_params=pltpu.CompilerParams(
            dimension_semantics=("parallel", "arbitrary"),
            vmem_limit_bytes=vmem_limit),
        cost_estimate=cost,
    )(inputs, targets, mask)

    return out[:, 0]  # (B,)


def _reference(inputs, targets, mask):
    x = inputs.astype(jnp.float32)
    z = targets.astype(jnp.float32)
    w = mask.astype(jnp.float32)
    loss = (jnp.maximum(x, 0.0) - x * z + jnp.log1p(jnp.exp(-jnp.abs(x)))) * w
    return jnp.mean(loss, axis=1)


if __name__ == "__main__":
    key = jax.random.PRNGKey(0)
    k1, k2, k3, k4, k5, k6 = jax.random.split(key, 6)

    # --- f32 streams, non-multiples of (8, 128) to exercise remainder tiles ---
    B, N = 40, 600
    inputs = jax.random.normal(k1, (B, N), dtype=jnp.float32)
    targets = (jax.random.uniform(k2, (B, N)) > 0.5).astype(jnp.float32)
    mask = (jax.random.uniform(k3, (B, N)) > 0.2).astype(jnp.float32)
    ref = _reference(inputs, targets, mask)

    # Default tiles: TB=24 -> (2, 1) grid (both TCs busy on v7x), no col mask.
    out1 = jax.block_until_ready(binary_cross_entropy_loss(inputs, targets, mask))
    # Small tile maxima: (3, 3) grid, batch + item remainder tiles, lane accum.
    out2 = jax.block_until_ready(
        binary_cross_entropy_loss(inputs, targets, mask, tb_max=16, tn_max=256))

    assert out1.shape == (B,) and out2.shape == (B,)
    assert jnp.allclose(out1, ref, atol=1e-5, rtol=1e-5)
    assert jnp.allclose(out2, ref, atol=1e-5, rtol=1e-5)

    # --- narrow-dtype streaming: bf16 logits + int8 targets/mask (4 B/elem) ---
    B2, N2 = 64, 512
    x_bf16 = jax.random.normal(k4, (B2, N2), dtype=jnp.float32).astype(jnp.bfloat16)
    t_i8 = (jax.random.uniform(k5, (B2, N2)) > 0.5).astype(jnp.int8)
    m_i8 = (jax.random.uniform(k6, (B2, N2)) > 0.2).astype(jnp.int8)
    ref_n = _reference(x_bf16, t_i8, m_i8)

    out3 = jax.block_until_ready(binary_cross_entropy_loss(x_bf16, t_i8, m_i8))
    out4 = jax.block_until_ready(
        binary_cross_entropy_loss(x_bf16, t_i8, m_i8, tb_max=16, tn_max=256))

    assert out3.shape == (B2,) and out4.shape == (B2,)
    assert jnp.allclose(out3, ref_n, atol=1e-5, rtol=1e-5)
    assert jnp.allclose(out4, ref_n, atol=1e-5, rtol=1e-5)

    print("KERNEL_OK")
</pallas_src>

<mosaic_0001>
module attributes {stable_mosaic.version = 11 : i64} {
  func.func @_bce_loss_kernel(%arg0: i32, %arg1: i32, %arg2: memref<24x600xf32, #tpu.memory_space<vmem>>, %arg3: memref<24x600xf32, #tpu.memory_space<vmem>>, %arg4: memref<24x600xf32, #tpu.memory_space<vmem>>, %arg5: memref<24x128xf32, #tpu.memory_space<vmem>>, %arg6: memref<24x1xf32, #tpu.memory_space<vmem>>) attributes {dimension_semantics = [#tpu.dimension_semantics<parallel>, #tpu.dimension_semantics<arbitrary>], iteration_bounds = array<i64: 2, 1>, scalar_prefetch = 0 : i64, scratch_operands = 1 : i64, tpu.core_type = #tpu.core_type<tc>, window_params = [{transform_indices = @transform_0, window_bounds = array<i64: 24, 600>}, {transform_indices = @transform_1, window_bounds = array<i64: 24, 600>}, {transform_indices = @transform_2, window_bounds = array<i64: 24, 600>}, {transform_indices = @transform_3, window_bounds = array<i64: 24, 128>}]} {
    %c0_i32 = arith.constant 0 : i32
    %0 = arith.cmpi eq, %arg1, %c0_i32 : i32
    %1 = arith.extui %0 : i1 to i32
    %c0_i32_0 = arith.constant 0 : i32
    %2 = arith.cmpi ne, %1, %c0_i32_0 : i32
    scf.if %2 {
      %cst_14 = arith.constant 0.000000e+00 : f32
      %25 = vector.broadcast %cst_14 : f32 to vector<24x1xf32>
      %c0_15 = arith.constant 0 : index
      %c0_16 = arith.constant 0 : index
      %26 = vector.load %arg6[%c0_15, %c0_16] : memref<24x1xf32, #tpu.memory_space<vmem>>, vector<24x1xf32>
      tpu.vector_store %arg6[%c0_15, %c0_16], %25 {strides = array<i32>} : memref<24x1xf32, #tpu.memory_space<vmem>>, vector<24x1xf32>,
    } else {
    }
    %c0 = arith.constant 0 : index
    %c0_1 = arith.constant 0 : index
    %3 = vector.load %arg2[%c0, %c0_1] : memref<24x600xf32, #tpu.memory_space<vmem>>, vector<24x600xf32>
    %c0_2 = arith.constant 0 : index
    %c0_3 = arith.constant 0 : index
    %4 = vector.load %arg3[%c0_2, %c0_3] : memref<24x600xf32, #tpu.memory_space<vmem>>, vector<24x600xf32>
    %c0_4 = arith.constant 0 : index
    %c0_5 = arith.constant 0 : index
    %5 = vector.load %arg4[%c0_4, %c0_5] : memref<24x600xf32, #tpu.memory_space<vmem>>, vector<24x600xf32>
    %cst = arith.constant 0.000000e+00 : f32
    %6 = vector.broadcast %cst : f32 to vector<24x600xf32>
    %7 = arith.maximumf %3, %6 : vector<24x600xf32>
    %8 = arith.mulf %3, %4 : vector<24x600xf32>
    %9 = arith.subf %7, %8 : vector<24x600xf32>
    %10 = math.absf %3 : vector<24x600xf32>
    %cst_6 = arith.constant 0.000000e+00 : f32
    %11 = vector.broadcast %cst_6 : f32 to vector<24x600xf32>
    %12 = arith.subf %11, %10 : vector<24x600xf32>
    %13 = math.exp %12 : vector<24x600xf32>
    %14 = math.log1p %13 : vector<24x600xf32>
    %15 = arith.addf %9, %14 : vector<24x600xf32>
    %16 = arith.mulf %15, %5 : vector<24x600xf32>
    %c0_7 = arith.constant 0 : index
    %c0_8 = arith.constant 0 : index
    %17 = vector.load %arg6[%c0_7, %c0_8] : memref<24x1xf32, #tpu.memory_space<vmem>>, vector<24x1xf32>
    %cst_9 = arith.constant dense<0.000000e+00> : vector<24xf32>
    %18 = vector.multi_reduction <add>, %16, %cst_9 [1] : vector<24x600xf32> to vector<24xf32>
    %19 = vector.shape_cast %18 : vector<24xf32> to vector<24x1xf32>
    %20 = arith.addf %17, %19 : vector<24x1xf32>
    %c0_10 = arith.constant 0 : index
    %c0_11 = arith.constant 0 : index
    %21 = vector.load %arg6[%c0_10, %c0_11] : memref<24x1xf32, #tpu.memory_space<vmem>>, vector<24x1xf32>
    tpu.vector_store %arg6[%c0_10, %c0_11], %20 {strides = array<i32>} : memref<24x1xf32, #tpu.memory_space<vmem>>, vector<24x1xf32>,
    %c0_i32_12 = arith.constant 0 : i32
    %22 = arith.cmpi eq, %arg1, %c0_i32_12 : i32
    %23 = arith.extui %22 : i1 to i32
    %c0_i32_13 = arith.constant 0 : i32
    %24 = arith.cmpi ne, %23, %c0_i32_13 : i32
    scf.if %24 {
      %c0_14 = arith.constant 0 : index
      %c0_15 = arith.constant 0 : index
      %25 = vector.load %arg6[%c0_14, %c0_15] : memref<24x1xf32, #tpu.memory_space<vmem>>, vector<24x1xf32>
      %cst_16 = arith.constant 0.00166666671 : f32
      %26 = vector.broadcast %cst_16 : f32 to vector<24x1xf32>
      %27 = arith.mulf %25, %26 : vector<24x1xf32>
      %28 = vector.shape_cast %27 : vector<24x1xf32> to vector<24x1xf32>
      %29 = vector.broadcast %28 : vector<24x1xf32> to vector<24x128xf32>
      %c0_17 = arith.constant 0 : index
      %c0_18 = arith.constant 0 : index
      %30 = vector.load %arg5[%c0_17, %c0_18] : memref<24x128xf32, #tpu.memory_space<vmem>>, vector<24x128xf32>
      tpu.vector_store %arg5[%c0_17, %c0_18], %29 {strides = array<i32>} : memref<24x128xf32, #tpu.memory_space<vmem>>, vector<24x128xf32>,
    } else {
    }
    return
  }
  func.func @transform_0(%arg0: i32, %arg1: i32) -> (i32, i32) {
    %c0_i32 = arith.constant 0 : i32
    return %arg0, %arg1 : i32, i32
  }
  func.func @transform_1(%arg0: i32, %arg1: i32) -> (i32, i32) {
    %c0_i32 = arith.constant 0 : i32
    return %arg0, %arg1 : i32, i32
  }
  func.func @transform_2(%arg0: i32, %arg1: i32) -> (i32, i32) {
    %c0_i32 = arith.constant 0 : i32
    return %arg0, %arg1 : i32, i32
  }
  func.func @transform_3(%arg0: i32, %arg1: i32) -> (i32, i32) {
    %c0_i32 = arith.constant 0 : i32
    %c0_i32_0 = arith.constant 0 : i32
    return %arg0, %c0_i32 : i32, i32
  }
}

</mosaic_0001>

<bundles_post_ra>
// kernel: tpu_custom_call.1
= control target key start
LH: loop header
LB: loop body
LE: loop exit
PB: predicated region body
PF: predicated region fallthrough
CT: control target
= control target key end

     0   :  { %8 = vsyncpa [#allocation4], 0  ;;  %s1770_s0 = inlined_call_operand.hbm [shape: f32[40,600], index: 0, kind: input, shape index: {}]   ;;  %s1771_s1 = inlined_call_operand.hbm [shape: f32[40,600], index: 1, kind: input, shape index: {}]   ;;  %s1772_s2 = inlined_call_operand.hbm [shape: f32[40,600], index: 2, kind: input, shape index: {}]   ;;  %s1773_s3 = inlined_call_operand.hbm [shape: f32[40,128], index: 3, kind: output, shape index: {}]  }
   0x1   :  { %10 = vsyncpa [#allocation4 + $0x1], 0 }
   0x2   :  { %11 = vsyncpa [#allocation7], 0 }
   0x3   :  { %13 = vsyncpa [#allocation7 + $0x1], 0 }
   0x4   :  { %14 = vsyncpa [#allocation5], 0 }
   0x5   :  { %16 = vsyncpa [#allocation5 + $0x1], 0  ;;  %s1249_s12 = smov 0   ;;  %s1251_s13 = smov 0  }
   0x6   :  { %s1253_s14 = smov 0   ;;  %s1255_s15 = smov 0  }
   0x7   :  { %s1257_s16 = smov 0   ;;  %s1259_s17 = smov 0  }
   0x8 LB: > { %s1280_s18 = sadd.s32 4294967295, %s1213_s17   ;;  %s876_s19 = sadd.s32 4294967294, %s1213_s17   ;;  %s1213_s17 = sphi %s1259_s17, %s22_s17   ;;  %s1209_s16 = sphi %s1257_s16, %s1814_s16   ;;  %s1205_s15 = sphi %s1255_s15, %s1813_s15   ;;  %s1201_s14 = sphi %s1253_s14, %s1812_s14   ;;  %s1197_s13 = sphi %s1251_s13, %s1811_s13   ;;  %s1193_s12 = sphi %s1249_s12, %s1810_s12  }
   0x9   : > { %s34_s20 = sadd.s32 1, %s1209_s16  ;;  %s43_s21 = sadd.s32 1, %s1201_s14 }
   0xa   : > { %p36_p0 = scmp.ge.s32.totalorder %s34_s20, 2  ;;  %p50_p1 = scmp.ne.s32.totalorder %s1201_s14, %s1197_s13 }
   0xb   : > { %p51_p2 = scmp.eq.s32.totalorder %s1213_s17, 0  ;;  %p56_p3 = scmp.ne.s32.totalorder %s1197_s13, %s1193_s12 }
   0xc   : > { %s1816_s20 = smov (%p36_p0, %s34_s20), 0  ;;  %p57_p5 = scmp.eq.s32.totalorder %s1280_s18, 0 }
   0xd   : > { %p1292_p4 = por %p51_p2, %p50_p1  ;;  %s38_s23 = ssub.s32 %s1209_s16, %s1816_s20 }
   0xe   : > { %p136_p6 = scmp.eq.s32.totalorder %s1280_s18, 1  ;;  %p41_p7 = scmp.eq.s32.totalorder %s38_s23, 0 }
   0xf   : > { %p1300_p8 = por %p57_p5, %p56_p3  ;;  %p142_p10 = scmp.eq.s32.totalorder %s876_s19, 1 }
  0x10   : > { %p1304_p9 = por %p136_p6, %p50_p1  ;;  %p1774_p12 = scmp.ge.s32.totalorder %s1213_s17, 2 }
  0x11   : > { %s1309_s26 = scalar_select %p41_p7, %s1201_s14, %s43_s21  }
  0x12   : > { %s1777_s25 = scalar_select %p1304_p9, 1, 0 }
  0x13   : > { %p1311_p11 = por %p142_p10, %p56_p3  ;;  %158 = sbr.rel (%p1774_p12) target bundleno = 134 (0x86), region = 16 }
  0x15   : > { %s1778_s27 = scalar_select %p1311_p11, 1, 0 }
  0x1a   : > { %161 = sbr.rel (!%p1292_p4) target bundleno = 62 (0x3e), region = 20  ;;  %s162_s28 = sand.u32 (%p1292_p4), 1, %s1201_s14  }
  0x1b   : > { %s167_s29 = smul.u32 (%p1292_p4), 3, %s1209_s16  ;;  %s1325_s7 = scalar_lea.sflag (%p1292_p4), [#allocation4], %s162_s28 }
  0x1c   : > { %s903_s30 = smul.u32 (%p1292_p4), 120, %s162_s28 }
  0x1d   : > { %s169_s4 = ssub.s32 (%p1292_p4), 5, %s167_s29 }
  0x1e   : > { %p170_p13 = scmp.lt.s32.totalorder (%p1292_p4), %s169_s4, 3  ;;  %s166_s8 = scalar_lea.vmem (%p1292_p4), [#allocation3], %s903_s30 }
  0x21   : > { %s1818_s4 = smov (!%p170_p13, %s169_s4), 3 }
  0x22   : > { %s1322_s5 = smul.u32 640, %s1818_s4 }
  0x24   : > { %s175_s6 = ssub.s32 1920, %s1322_s5 }
  0x25   : > { %176 = vsyncadd %s1325_s7, %s175_s6  ;;  %p881_p0 = scmp.ne.s32.totalorder %s1322_s5, 0  ;;  %s919_s9 = smul.u32 1920, %s1209_s16 }
  0x26   : > { %s183_s10 = sshll.u32 %s166_s8, 4  ;;  %s1047_s30 = scalar_lea.hbm %s1770_s0, 3200  ;;  %s1335_s10 = int_to_ptr.vmem [resolvable:$true] %s183_s10 }
  0x27   : > { %s1333_s21 = scalar_lea.hbm %s1770_s0, %s919_s9 }
  0x28   : > { %s1043_s23 = scalar_lea.hbm %s1333_s21, %s1322_s5  ;;  %p1048_p5 = scmp.lt.u32.totalorder %s1333_s21, %s1770_s0 }
  0x29   : > { %p1044_p1 = scmp.ne.s32.totalorder %s1333_s21, %s1043_s23  ;;  %p1049_p6 = scmp.lt.u32.totalorder %s1047_s30, %s1043_s23 }
  0x2a   : > { %p1051_p10 = scmp.lt.u32.totalorder %s1043_s23, %s1333_s21 }
  0x2b   : > { %p1045_p2 = pnand %p1044_p1, %p881_p0  ;;  %p1050_p7 = por %p1049_p6, %p1048_p5 }
  0x2d   : > { %p1046_p3 = pneg %p1045_p2  ;;  %p1052_p13 = por %p1051_p10, %p1050_p7 }
  0x2f   : > { %p1053_p12 = pnand %p1052_p13, %p1046_p3 }
  0x31   : > { %1056 = shalt.err (!%p1053_p12)
}
  0x32   : > { %s1057_s8 = scalar_lea.vmem %s1335_s10, %s1322_s5  ;;  %s1215_s9 = smov [#allocation3]  }
  0x33   : > { %p1058_p1 = scmp.ne.s32.totalorder %s1335_s10, %s1057_s8  ;;  %s1061_s11 = sshll.u32 %s1215_s9, 4  ;;  %s1062_s11 = int_to_ptr.vmem [resolvable:$false] %s1061_s11 }
  0x34   : > { %s1063_s19 = scalar_lea.vmem %s1062_s11, 3840  ;;  %p1064_p9 = scmp.lt.s32.totalorder %s1335_s10, %s1062_s11 }
  0x35   : > { %p1059_p2 = pnand %p1058_p1, %p881_p0  ;;  %p1065_p5 = scmp.lt.s32.totalorder %s1063_s19, %s1057_s8 }
  0x37   : > { %p1060_p11 = pneg %p1059_p2  ;;  %p1066_p6 = por %p1065_p5, %p1064_p9 }
  0x39   : > { %p1067_p7 = pnand %p1066_p6, %p1060_p11 }
  0x3b   : > { %1070 = shalt.err (!%p1067_p7)
}
  0x3c   : > { %s1216_s23 = smov 640   ;;  %s1217_s28 = smov 40  }
  0x3d   : > { %189 = dma.hbm_to_vmem [thread:$0]  (%p881_p0), %s1333_s21, %s1322_s5, %s1335_s10, %s1325_s7, %s1216_s23, %s1216_s23, %s1217_s28  }
  0x3e PF: > { %192 = sbr.rel (!%p1292_p4) target bundleno = 98 (0x62), region = 24  ;;  %s193_s29 = sand.u32 (%p1292_p4), 1, %s1213_s17  }
  0x3f   : > { %s195_s30 = sand.u32 (%p1292_p4), 1, %s1201_s14   ;;  %s198_s6 = smul.u32 (%p1292_p4), 3, %s1209_s16 }
  0x40   : > { %s905_s4 = smul.u32 (%p1292_p4), 120, %s195_s30  ;;  %s1370_s19 = scalar_lea.sflag (%p1292_p4), [#allocation7], %s193_s29 }
  0x41   : > { %s200_s8 = ssub.s32 (%p1292_p4), 5, %s198_s6 }
  0x42   : > { %p201_p9 = scmp.lt.s32.totalorder (%p1292_p4), %s200_s8, 3  ;;  %s197_s5 = scalar_lea.vmem (%p1292_p4), [#allocation6], %s905_s4 }
  0x45   : > { %s1820_s8 = smov (!%p201_p9, %s200_s8), 3 }
  0x46   : > { %s1367_s9 = smul.u32 640, %s1820_s8 }
  0x48   : > { %s206_s11 = ssub.s32 1920, %s1367_s9 }
  0x49   : > { %207 = vsyncadd %s1370_s19, %s206_s11  ;;  %p886_p11 = scmp.ne.s32.totalorder %s1367_s9, 0  ;;  %s920_s7 = smul.u32 1920, %s1209_s16 }
  0x4a   : > { %s214_s10 = sshll.u32 %s197_s5, 4  ;;  %s1075_s6 = scalar_lea.hbm %s1771_s1, 3200  ;;  %s1380_s10 = int_to_ptr.vmem [resolvable:$true] %s214_s10 }
  0x4b   : > { %s1378_s28 = scalar_lea.hbm %s1771_s1, %s920_s7 }
  0x4c   : > { %s1071_s29 = scalar_lea.hbm %s1378_s28, %s1367_s9  ;;  %p1076_p10 = scmp.lt.u32.totalorder %s1378_s28, %s1771_s1 }
  0x4d   : > { %p1072_p12 = scmp.ne.s32.totalorder %s1378_s28, %s1071_s29  ;;  %p1077_p13 = scmp.lt.u32.totalorder %s1075_s6, %s1071_s29 }
  0x4e   : > { %p1079_p2 = scmp.lt.u32.totalorder %s1071_s29, %s1378_s28 }
  0x4f   : > { %p1073_p0 = pnand %p1072_p12, %p886_p11  ;;  %p1078_p1 = por %p1077_p13, %p1076_p10 }
  0x51   : > { %p1074_p3 = pneg %p1073_p0  ;;  %p1080_p5 = por %p1079_p2, %p1078_p1 }
  0x53   : > { %p1081_p6 = pnand %p1080_p5, %p1074_p3 }
  0x55   : > { %1084 = shalt.err (!%p1081_p6)
}
  0x56   : > { %s1085_s5 = scalar_lea.vmem %s1380_s10, %s1367_s9  ;;  %s1218_s7 = smov [#allocation6]  }
  0x57   : > { %p1086_p7 = scmp.ne.s32.totalorder %s1380_s10, %s1085_s5  ;;  %s1089_s21 = sshll.u32 %s1218_s7, 4  ;;  %s1090_s21 = int_to_ptr.vmem [resolvable:$false] %s1089_s21 }
  0x58   : > { %s1091_s23 = scalar_lea.vmem %s1090_s21, 3840  ;;  %p1092_p0 = scmp.lt.s32.totalorder %s1380_s10, %s1090_s21 }
  0x59   : > { %p1087_p9 = pnand %p1086_p7, %p886_p11  ;;  %p1093_p10 = scmp.lt.s32.totalorder %s1091_s23, %s1085_s5 }
  0x5b   : > { %p1088_p12 = pneg %p1087_p9  ;;  %p1094_p13 = por %p1093_p10, %p1092_p0 }
  0x5d   : > { %p1095_p1 = pnand %p1094_p13, %p1088_p12 }
  0x5f   : > { %1098 = shalt.err (!%p1095_p1)
}
  0x60   : > { %s1219_s29 = smov 640   ;;  %s1220_s30 = smov 40  }
  0x61   : > { %220 = dma.hbm_to_vmem [thread:$0]  (%p886_p11), %s1378_s28, %s1367_s9, %s1380_s10, %s1370_s19, %s1219_s29, %s1219_s29, %s1220_s30  }
  0x62 PF: > { %223 = sbr.rel (!%p1292_p4) target bundleno = 134 (0x86), region = 28  ;;  %s224_s4 = sand.u32 (%p1292_p4), 1, %s1213_s17  }
  0x63   : > { %s226_s6 = sand.u32 (%p1292_p4), 1, %s1201_s14   ;;  %s229_s11 = smul.u32 (%p1292_p4), 3, %s1209_s16 }
  0x64   : > { %s907_s8 = smul.u32 (%p1292_p4), 120, %s226_s6  ;;  %s1415_s23 = scalar_lea.sflag (%p1292_p4), [#allocation7], %s224_s4 }
  0x65   : > { %s231_s5 = ssub.s32 (%p1292_p4), 5, %s229_s11 }
  0x66   : > { %p232_p3 = scmp.lt.s32.totalorder (%p1292_p4), %s231_s5, 3  ;;  %s228_s9 = scalar_lea.vmem (%p1292_p4), [#allocation8], %s907_s8 }
  0x69   : > { %s1822_s5 = smov (!%p232_p3, %s231_s5), 3 }
  0x6a   : > { %s1412_s7 = smul.u32 640, %s1822_s5 }
  0x6c   : > { %s237_s21 = ssub.s32 1920, %s1412_s7 }
  0x6d   : > { %238 = vsyncadd %s1415_s23, %s237_s21  ;;  %p891_p4 = scmp.ne.s32.totalorder %s1412_s7, 0  ;;  %s921_s22 = smul.u32 1920, %s1209_s16 }
  0x6e   : > { %s245_s19 = sshll.u32 %s228_s9, 4  ;;  %s1103_s8 = scalar_lea.hbm %s1772_s2, 3200  ;;  %s1425_s19 = int_to_ptr.vmem [resolvable:$true] %s245_s19 }
  0x6f   : > { %s1423_s29 = scalar_lea.hbm %s1772_s2, %s921_s22 }
  0x70   : > { %s1099_s30 = scalar_lea.hbm %s1423_s29, %s1412_s7  ;;  %p1104_p6 = scmp.lt.u32.totalorder %s1423_s29, %s1772_s2 }
  0x71   : > { %p1100_p11 = scmp.ne.s32.totalorder %s1423_s29, %s1099_s30  ;;  %p1105_p7 = scmp.lt.u32.totalorder %s1103_s8, %s1099_s30 }
  0x72   : > { %p1107_p12 = scmp.lt.u32.totalorder %s1099_s30, %s1423_s29 }
  0x73   : > { %p1101_p2 = pnand %p1100_p11, %p891_p4  ;;  %p1106_p9 = por %p1105_p7, %p1104_p6 }
  0x75   : > { %p1102_p5 = pneg %p1101_p2  ;;  %p1108_p0 = por %p1107_p12, %p1106_p9 }
  0x77   : > { %p1109_p10 = pnand %p1108_p0, %p1102_p5 }
  0x79   : > { %1112 = shalt.err (!%p1109_p10)
}
  0x7a   : > { %s1113_s21 = scalar_lea.vmem %s1425_s19, %s1412_s7  ;;  %s1221_s9 = smov [#allocation8]  }
  0x7b   : > { %p1114_p13 = scmp.ne.s32.totalorder %s1425_s19, %s1113_s21  ;;  %s1117_s22 = sshll.u32 %s1221_s9, 4  ;;  %s1118_s22 = int_to_ptr.vmem [resolvable:$false] %s1117_s22 }
  0x7c   : > { %s1119_s10 = scalar_lea.vmem %s1118_s22, 3840  ;;  %p1120_p11 = scmp.lt.s32.totalorder %s1425_s19, %s1118_s22 }
  0x7d   : > { %p1115_p1 = pnand %p1114_p13, %p891_p4  ;;  %p1121_p2 = scmp.lt.s32.totalorder %s1119_s10, %s1113_s21 }
  0x7f   : > { %p1116_p3 = pneg %p1115_p1  ;;  %p1122_p6 = por %p1121_p2, %p1120_p11 }
  0x81   : > { %p1123_p7 = pnand %p1122_p6, %p1116_p3 }
  0x83   : > { %1126 = shalt.err (!%p1123_p7)
}
  0x84   : > { %s1222_s28 = smov 640   ;;  %s1223_s30 = smov 40  }
  0x85   : > { %251 = dma.hbm_to_vmem [thread:$0]  (%p891_p4), %s1423_s29, %s1412_s7, %s1425_s19, %s1415_s23, %s1222_s28, %s1222_s28, %s1223_s30  }
  0x86 PF: > { %p894_p5 = scmp.ge.s32.totalorder %s1213_s17, 1  ;;  %p253_p9 = scmp.lt.s32.totalorder %s1213_s17, 3 }
  0x88   : > { %p254_p12 = pnand %p894_p5, %p253_p9 }
  0x89   : > { %s1455_s4 = sand.u32 (!%p254_p12), 1, %s1197_s13  }
  0x8a   : > { %257 = sbr.rel (%p254_p12) target bundleno = 551 (0x227), region = 32  ;;  %s260_s8 = scalar_lea.sflag (!%p254_p12), [#allocation4], %s1455_s4 }
  0x8b   : > { %s1458_s6 = smul.u32 (!%p254_p12), 120, %s1455_s4 }
  0x8d   : > { %s1462_s11 = scalar_lea.vmem (!%p254_p12), [#allocation3], %s1458_s6 }
  0x91   : > { %1180 = dma.done.wait (%p1300_p8), %s260_s8, 1920  }
  0x92   : > { %1182 = vsyncadd (%p1300_p8), %s260_s8, 4294965376  ;;  %s268_s7 = sand.u32 1, %s1280_s18   ;;  %s1470_s19 = scalar_lea.vmem [#allocation6], %s1458_s6 }
  0x93   : > { %s269_s23 = scalar_lea.sflag [#allocation7], %s268_s7 }
  0x94   : > { %1184 = dma.done.wait (%p1300_p8), %s269_s23, 3840  }
  0x95   : > { %1186 = vsyncadd (%p1300_p8), %s269_s23, 4294963456  ;;  %vm344_vm0 = vcmask 7168   ;;  %v1224_v0 = vmov 0.0   ;;  %v348_v1 = vld [vmem:[%s1462_s11] sm:$0xff]  ;;  %v349_v2 = vld [vmem:[%s1462_s11 + $0x8] sm:$0xff]  ;;  %s1554_s18 = scalar_lea.vmem [#allocation8], %s1458_s6 }
  0x96   : > { %345 = vst.msk [vmem:[#allocation2] sm:$0xff] %vm344_vm0, %v1224_v0  ;;  %346 = vst.msk [vmem:[#allocation2 + $0x8] sm:$0xff] %vm344_vm0, %v1224_v0  ;;  %v350_v3 = vld [vmem:[%s1462_s11 + $0x10] sm:$0xff]  ;;  %v351_v4 = vld [vmem:[%s1462_s11 + $0x18] sm:$0xff]  ;;  %v438_v6 = vand.u32 2147483647, %v348_v1 }
  0x97   : > { %347 = vst.msk [vmem:[#allocation2 + $0x10] sm:$0xff] %vm344_vm0, %v1224_v0  ;;  %v352_v5 = vld [vmem:[%s1462_s11 + $0x20] sm:$0xff]  ;;  %v439_v7 = vand.u32 2147483647, %v349_v2  ;;  %v440_v8 = vand.u32 2147483647, %v350_v3 }
  0x98   : > { %v393_v9 = vmax.f32 %v348_v1, 0.0  ;;  %v441_v10 = vand.u32 2147483647, %v351_v4  ;;  %v442_v11 = vand.u32 2147483647, %v352_v5  ;;  %v453_v12 = vsub.f32 0.0, %v438_v6 }
  0x99   : > { %v363_v13 = vld [vmem:[%s1470_s19] sm:$0xff]  ;;  %v364_v14 = vld [vmem:[%s1470_s19 + $0x8] sm:$0xff]  ;;  %v394_v15 = vmax.f32 %v349_v2, 0.0  ;;  %v395_v16 = vmax.f32 %v350_v3, 0.0  ;;  %v454_v17 = vsub.f32 0.0, %v439_v7  ;;  %v455_v18 = vsub.f32 0.0, %v440_v8 }
  0x9a   : > { %v365_v19 = vld [vmem:[%s1470_s19 + $0x10] sm:$0xff]  ;;  %v366_v20 = vld [vmem:[%s1470_s19 + $0x18] sm:$0xff]  ;;  %v456_v21 = vsub.f32 0.0, %v441_v10  ;;  %v457_v22 = vsub.f32 0.0, %v442_v11  ;;  %v468_v23 = vmul.f32 1.442695, %v453_v12  ;;  %v408_v28 = vmul.f32 %v363_v13, %v348_v1 }
  0x9b   : > { %v367_v24 = vld [vmem:[%s1470_s19 + $0x20] sm:$0xff]  ;;  %v396_v25 = vmax.f32 %v351_v4, 0.0  ;;  %v470_v26 = vmul.f32 1.442695, %v454_v17  ;;  %v472_v27 = vmul.f32 1.442695, %v455_v18  ;;  %v409_v31 = vmul.f32 %v364_v14, %v349_v2 }
  0x9c   : > { %983 = vpow2.f32 %v468_v23  ;;  %v474_v29 = vmul.f32 1.442695, %v456_v21  ;;  %v476_v30 = vmul.f32 1.442695, %v457_v22  ;;  %v410_v32 = vmul.f32 %v365_v19, %v350_v3  ;;  %v358_v34 = vld [vmem:[%s1462_s11 + $0x50] sm:$0xff]  ;;  %v359_v35 = vld [vmem:[%s1462_s11 + $0x58] sm:$0xff] }
  0x9d   : > { %v411_v33 = vmul.f32 %v366_v20, %v351_v4  ;;  %985 = vpow2.f32 %v470_v26  ;;  %v397_v36 = vmax.f32 %v352_v5, 0.0  ;;  %v412_v37 = vmul.f32 %v367_v24, %v352_v5  ;;  %v1492_v38 = vld [vmem:[%s1462_s11 + $0x60] sm:$0xff]  ;;  %v374_v41 = vld [vmem:[%s1470_s19 + $0x58] sm:$0xff]  ;;  %v375_v42 = vld [vmem:[%s1470_s19 + $0x60] sm:$0xff]  ;;  %s910_s24 = smul.u32 24, %s1455_s4  ;;  %s723_s5 = scalar_lea.sflag [#allocation5], %s1455_s4 }
  0x9e   : > { %987 = vpow2.f32 %v472_v27  ;;  %v373_v39 = vld [vmem:[%s1470_s19 + $0x50] sm:$0xff]  ;;  %v1495_v40 = vsub.f32 %v393_v9, %v408_v28  ;;  %v448_v43 = vand.u32 2147483647, %v358_v34  ;;  %v449_v44 = vand.u32 2147483647, %v359_v35  ;;  %v361_v48 = vld [vmem:[%s1462_s11 + $0x68] sm:$0xff] }
  0x9f   : > { %989 = vpow2.f32 %v474_v29  ;;  %v1499_v45 = vsub.f32 %v394_v15, %v409_v31  ;;  %v1501_v46 = vsub.f32 %v395_v16, %v410_v32  ;;  %v1503_v47 = vsub.f32 %v396_v25, %v411_v33  ;;  %v376_v49 = vld [vmem:[%s1470_s19 + $0x68] sm:$0xff]  ;;  %v1511_v52 = vld [vmem:[%s1462_s11 + $0x70] sm:$0xff]  ;;  %v377_v56 = vld [vmem:[%s1470_s19 + $0x70] sm:$0xff]  ;;  %s313_s29 = scalar_lea.vmem [#allocation9], %s910_s24  ;;  %p1807_p8 = scmp.ne.s32.totalorder %s1777_s25, 0 }
  0xa0   : > { %991 = vpow2.f32 %v476_v30  ;;  %v450_v50 = vand.u32 2147483647, %v1492_v38  ;;  %v1508_v51 = vsub.f32 %v397_v36, %v412_v37  ;;  %v403_v53 = vmax.f32 %v358_v34, 0.0  ;;  %s730_s21 = smul.u32 (%p1807_p8), 3, %s1205_s15 }
  0xa1   : > { %v463_v54 = vsub.f32 0.0, %v448_v43  ;;  %v464_v55 = vsub.f32 0.0, %v449_v44  ;;  %v418_v57 = vmul.f32 %v373_v39, %v358_v34  ;;  %v419_v58 = vmul.f32 %v374_v41, %v359_v35 }
  0xa2   : > { %v420_v59 = vmul.f32 %v375_v42, %v1492_v38  ;;  %v465_v60 = vsub.f32 0.0, %v450_v50  ;;  %v421_v61 = vmul.f32 %v376_v49, %v361_v48  ;;  %v451_v62 = vand.u32 2147483647, %v361_v48  ;;  %s731_s9 = ssub.s32 (%p1807_p8), 5, %s730_s21 }
  0xa3   : > { %v488_v63 = vmul.f32 1.442695, %v463_v54  ;;  %v490_v0 = vmul.f32 1.442695, %v464_v55  ;;  %v404_v1 = vmax.f32 %v359_v35, 0.0  ;;  %v405_v2 = vmax.f32 %v1492_v38, 0.0 }
  0xa4   : > { %v452_v3 = vand.u32 2147483647, %v1511_v52  ;;  %v492_v4 = vmul.f32 1.442695, %v465_v60  ;;  %v406_v6 = vmax.f32 %v361_v48, 0.0  ;;  %v407_v7 = vmax.f32 %v1511_v52, 0.0 }
  0xa5   : > { %v1519_v8 = vmul.f32 %v377_v56, %v1511_v52  ;;  %993 = vpow2.f32 %v488_v63  ;;  %v1521_v12 = vsub.f32 %v403_v53, %v418_v57  ;;  %v466_v16 = vsub.f32 0.0, %v451_v62  ;;  %v381_v35 = vld [vmem:[%s1554_s18 + $0x18] sm:$0xff]  ;;  %v1583_v48 = vld [vmem:[%s1462_s11 + $0x28] sm:$0xff]  ;;  %p732_p4 = scmp.lt.s32.totalorder (%p1807_p8), %s731_s9, 3 }
  0xa6   : > { %v984_v5 = vpop.eup %983  ;;  %995 = vpow2.f32 %v490_v0  ;;  %v1523_v19 = vsub.f32 %v404_v1, %v419_v58  ;;  %v467_v20 = vsub.f32 0.0, %v452_v3  ;;  %v1525_v33 = vsub.f32 %v405_v2, %v420_v59 }
  0xa7   : > { %v986_v9 = vpop.eup %985  ;;  %v498_v10 = vadd.f32 1.0, %v984_v5  ;;  %v501_v11 = vmul.f32 -0.5, %v984_v5  ;;  %997 = vpow2.f32 %v492_v4  ;;  %v504_v22 = vand.u32 2147483647, %v984_v5 }
  0xa8   : > { %v988_v13 = vpop.eup %987  ;;  %v507_v14 = vadd.f32 1.0, %v986_v9  ;;  %v510_v15 = vmul.f32 -0.5, %v986_v9  ;;  %v513_v23 = vand.u32 2147483647, %v986_v9  ;;  %v494_v31 = vmul.f32 1.442695, %v466_v16 }
  0xa9   : > { %v990_v17 = vpop.eup %989  ;;  %999 = vlog2.f32 %v498_v10  ;;  %v516_v18 = vadd.f32 1.0, %v988_v13  ;;  %v519_v24 = vmul.f32 -0.5, %v988_v13  ;;  %v502_v25 = vadd.f32 1.0, %v501_v11  ;;  %v378_v11 = vld [vmem:[%s1554_s18] sm:$0xff] }
  0xaa   : > { %v992_v21 = vpop.eup %991  ;;  %1001 = vlog2.f32 %v507_v14  ;;  %v511_v26 = vadd.f32 1.0, %v510_v15  ;;  %v525_v27 = vadd.f32 1.0, %v990_v17  ;;  %v522_v29 = vand.u32 2147483647, %v988_v13 }
  0xab   : > { %1003 = vlog2.f32 %v516_v18  ;;  %v520_v28 = vadd.f32 1.0, %v519_v24  ;;  %v528_v30 = vmul.f32 -0.5, %v990_v17  ;;  %v534_v32 = vadd.f32 1.0, %v992_v21  ;;  %v379_v18 = vld [vmem:[%s1554_s18 + $0x8] sm:$0xff] }
  0xac   : > { %1005 = vlog2.f32 %v525_v27  ;;  %v496_v34 = vmul.f32 1.442695, %v467_v20  ;;  %vm1527_vm1 = vcmp.lt.f32.partialorder %v504_v22, 0.0004427343  ;;  %v531_v36 = vand.u32 2147483647, %v990_v17 }
  0xad   : > { %v537_v37 = vmul.f32 -0.5, %v992_v21  ;;  %v1531_v38 = vsub.f32 %v406_v6, %v421_v61  ;;  %v503_v39 = vmul.f32 %v984_v5, %v502_v25  ;;  %v512_v41 = vmul.f32 %v986_v9, %v511_v26  ;;  %v380_v25 = vld [vmem:[%s1554_s18 + $0x10] sm:$0xff] }
  0xae   : > { %vm1533_vm2 = vcmp.lt.f32.partialorder %v513_v23, 0.0004427343  ;;  %1007 = vlog2.f32 %v534_v32  ;;  %v521_v44 = vmul.f32 %v988_v13, %v520_v28  ;;  %vm1537_vm3 = vcmp.lt.f32.partialorder %v522_v29, 0.0004427343 }
  0xaf   : > { %v994_v43 = vpop.eup %993  ;;  %v529_v49 = vadd.f32 1.0, %v528_v30  ;;  %1009 = vpow2.f32 %v494_v31  ;;  %v540_v53 = vand.u32 2147483647, %v992_v21  ;;  %vm1543_vm4 = vcmp.lt.f32.partialorder %v531_v36, 0.0004427343 }
  0xb0   : > { %v996_v50 = vpop.eup %995  ;;  %1011 = vpow2.f32 %v496_v34  ;;  %v588_v54 = vadd.f32 1.0, %v994_v43  ;;  %v591_v55 = vmul.f32 -0.5, %v994_v43  ;;  %v538_v58 = vadd.f32 1.0, %v537_v37 }
  0xb1   : > { %v1541_v56 = vpop.eup %997  ;;  %v597_v59 = vadd.f32 1.0, %v996_v50  ;;  %v600_v60 = vmul.f32 -0.5, %v996_v50  ;;  %v594_v62 = vand.u32 2147483647, %v994_v43  ;;  %v530_v3 = vmul.f32 %v990_v17, %v529_v49  ;;  %v382_v49 = vld [vmem:[%s1554_s18 + $0x20] sm:$0xff] }
  0xb2   : > { %1013 = vlog2.f32 %v588_v54  ;;  %v606_v63 = vadd.f32 1.0, %v1541_v56  ;;  %v609_v0 = vmul.f32 -0.5, %v1541_v56  ;;  %v592_v4 = vadd.f32 1.0, %v591_v55 }
  0xb3   : > { %v1000_v61 = vpop.eup %999  ;;  %1015 = vlog2.f32 %v597_v59  ;;  %vm1549_vm5 = vcmp.lt.f32.partialorder %v540_v53, 0.0004427343  ;;  %v603_v10 = vand.u32 2147483647, %v996_v50  ;;  %v539_v15 = vmul.f32 %v992_v21, %v538_v58 }
  0xb4   : > { %v1002_v1 = vpop.eup %1001  ;;  %v500_v2 = vmul.f32 0.6931472, %v1000_v61  ;;  %1017 = vlog2.f32 %v606_v63  ;;  %vm669_vm6 = vcmask 719872   ;;  %v601_v16 = vadd.f32 1.0, %v600_v60 }
  0xb5   : > { %v1004_v5 = vpop.eup %1003  ;;  %v509_v6 = vmul.f32 0.6931472, %v1002_v1  ;;  %vm1563_vm7 = vcmp.lt.f32.partialorder %v594_v62, 0.0004427343  ;;  %v610_v24 = vadd.f32 1.0, %v609_v0  ;;  %v593_v28 = vmul.f32 %v994_v43, %v592_v4  ;;  %v388_v4 = vld [vmem:[%s1554_s18 + $0x50] sm:$0xff] }
  0xb6   : > { %v506_v13 = vsel %vm1527_vm1, %v503_v39, %v500_v2  ;;  %v518_v14 = vmul.f32 0.6931472, %v1004_v5  ;;  %v1006_v17 = vpop.eup %1005  ;;  %vm1572_vm8 = vcmp.lt.f32.partialorder %v603_v10, 0.0004427343  ;;  %v612_v32 = vand.u32 2147483647, %v1541_v56 }
  0xb7   : > { %v515_v20 = vsel %vm1533_vm2, %v512_v41, %v509_v6  ;;  %v633_v22 = vadd.f32 %v506_v13, %v1495_v40  ;;  %v527_v21 = vmul.f32 0.6931472, %v1006_v17  ;;  %v602_v39 = vmul.f32 %v996_v50, %v601_v16  ;;  %v389_v5 = vld [vmem:[%s1554_s18 + $0x58] sm:$0xff] }
  0xb8   : > { %v524_v26 = vsel %vm1537_vm3, %v521_v44, %v518_v14  ;;  %v634_v27 = vadd.f32 %v515_v20, %v1499_v45  ;;  %v1008_v29 = vpop.eup %1007  ;;  %v611_v43 = vmul.f32 %v1541_v56, %v610_v24  ;;  %vm1589_vm9 = vcmp.lt.f32.partialorder %v612_v32, 0.0004427343  ;;  %v1606_v17 = vld [vmem:[%s1462_s11 + $0x38] sm:$0xff]  ;;  %v1612_v20 = vld [vmem:[%s1462_s11 + $0x48] sm:$0xff] }
  0xb9   : > { %v635_v30 = vadd.f32 %v524_v26, %v1501_v46  ;;  %v648_v31 = vmul.f32 %v633_v22, %v378_v11  ;;  %v1010_v34 = vpop.eup %1009  ;;  %v533_v36 = vsel %vm1543_vm4, %v530_v3, %v527_v21  ;;  %v536_v37 = vmul.f32 0.6931472, %v1008_v29  ;;  %v1599_v11 = vld [vmem:[%s1462_s11 + $0x30] sm:$0xff]  ;;  %v390_v26 = vld [vmem:[%s1554_s18 + $0x60] sm:$0xff] }
  0xba   : > { %v649_v45 = vmul.f32 %v634_v27, %v379_v18  ;;  %v1012_v41 = vpop.eup %1011  ;;  %v636_v42 = vadd.f32 %v533_v36, %v1503_v47  ;;  %v615_v44 = vadd.f32 1.0, %v1010_v34  ;;  %v618_v55 = vmul.f32 -0.5, %v1010_v34  ;;  %v1609_v18 = vld [vmem:[%s1462_s11 + $0x40] sm:$0xff]  ;;  %v392_v47 = vld [vmem:[%s1554_s18 + $0x70] sm:$0xff] }
  0xbb   : > { %v650_v46 = vmul.f32 %v635_v30, %v380_v25  ;;  %v542_v53 = vsel %vm1549_vm5, %v539_v15, %v536_v37  ;;  %v624_v57 = vadd.f32 1.0, %v1012_v41  ;;  %v443_v62 = vand.u32 2147483647, %v1583_v48 }
  0xbc   : > { %v666_v54 = vadd.f32 %v649_v45, %v648_v31  ;;  %v1014_v58 = vpop.eup %1013  ;;  %v637_v50 = vadd.f32 %v542_v53, %v1508_v51  ;;  %v651_v59 = vmul.f32 %v636_v42, %v381_v35  ;;  %1019 = vlog2.f32 %v615_v44 }
  0xbd   : > { %v1016_v56 = vpop.eup %1015  ;;  %v590_v61 = vmul.f32 0.6931472, %v1014_v58  ;;  %1021 = vlog2.f32 %v624_v57  ;;  %v621_v51 = vand.u32 2147483647, %v1010_v34  ;;  %v627_v2 = vmul.f32 -0.5, %v1012_v41 }
  0xbe   : > { %v667_v60 = vadd.f32 %v666_v54, %v650_v46  ;;  %v1018_v63 = vpop.eup %1017  ;;  %v652_v0 = vmul.f32 %v637_v50, %v382_v49  ;;  %v599_v1 = vmul.f32 0.6931472, %v1016_v56  ;;  %v619_v10 = vadd.f32 1.0, %v618_v55  ;;  %v391_v50 = vld [vmem:[%s1554_s18 + $0x68] sm:$0xff] }
  0xbf   : > { %v596_v6 = vsel %vm1563_vm7, %v593_v28, %v590_v61  ;;  %v608_v9 = vmul.f32 0.6931472, %v1018_v63  ;;  %v630_v15 = vand.u32 2147483647, %v1012_v41  ;;  %v628_v24 = vadd.f32 1.0, %v627_v2 }
  0xc0   : > { %v668_v3 = vadd.f32 %v667_v60, %v651_v59  ;;  %v670_v13 = vsel %vm669_vm6, %v652_v0, 0.0  ;;  %v605_v14 = vsel %vm1572_vm8, %v602_v39, %v599_v1  ;;  %v643_v16 = vadd.f32 %v596_v6, %v1521_v12 }
  0xc1   : > { %v614_v23 = vsel %vm1589_vm9, %v611_v43, %v608_v9  ;;  %v644_v25 = vadd.f32 %v605_v14, %v1523_v19  ;;  %vm1618_vm10 = vcmp.lt.f32.partialorder %v621_v51, 0.0004427343  ;;  %v444_v28 = vand.u32 2147483647, %v1599_v11  ;;  %v368_v9 = vld [vmem:[%s1470_s19 + $0x28] sm:$0xff]  ;;  %v370_v14 = vld [vmem:[%s1470_s19 + $0x38] sm:$0xff] }
  0xc2   : > { %v671_v22 = vadd.f32 %v670_v13, %v668_v3  ;;  %v645_v12 = vadd.f32 %v614_v23, %v1525_v33  ;;  %v658_v27 = vmul.f32 %v643_v16, %v388_v4  ;;  %v445_v30 = vand.u32 2147483647, %v1606_v17  ;;  %v369_v13 = vld [vmem:[%s1470_s19 + $0x30] sm:$0xff] }
  0xc3   : > { %v659_v29 = vmul.f32 %v644_v25, %v389_v5  ;;  %v446_v31 = vand.u32 2147483647, %v1609_v18  ;;  %v447_v40 = vand.u32 2147483647, %v1612_v20  ;;  %v620_v32 = vmul.f32 %v1010_v34, %v619_v10 }
  0xc4   : > { %672 = vadd.xlane.f32.xlu0 %v671_v22  ;;  %vm1627_vm11 = vcmp.lt.f32.partialorder %v630_v15, 0.0004427343  ;;  %v458_v35 = vsub.f32 0.0, %v443_v62  ;;  %v459_v36 = vsub.f32 0.0, %v444_v28  ;;  %v629_v37 = vmul.f32 %v1012_v41, %v628_v24 }
  0xc5   : > { %v460_v33 = vsub.f32 0.0, %v445_v30  ;;  %v461_v45 = vsub.f32 0.0, %v446_v31  ;;  %v462_v39 = vsub.f32 0.0, %v447_v40  ;;  %v660_v46 = vmul.f32 %v645_v12, %v390_v26  ;;  %v371_v26 = vld [vmem:[%s1470_s19 + $0x40] sm:$0xff] }
  0xc6   : > { %v1020_v42 = vpop.eup %1019  ;;  %v681_v43 = vadd.f32 %v659_v29, %v658_v27  ;;  %v478_v44 = vmul.f32 1.442695, %v458_v35  ;;  %v480_v49 = vmul.f32 1.442695, %v459_v36  ;;  %v437_v34 = vsub.f32 %v407_v7, %v1519_v8  ;;  %v372_v29 = vld [vmem:[%s1470_s19 + $0x48] sm:$0xff] }
  0xc7   : > { %v1022_v53 = vpop.eup %1021  ;;  %v617_v54 = vmul.f32 0.6931472, %v1020_v42  ;;  %v482_v55 = vmul.f32 1.442695, %v460_v33  ;;  %v484_v57 = vmul.f32 1.442695, %v461_v45  ;;  %v413_v24 = vmul.f32 %v368_v9, %v1583_v48 }
  0xc8   : > { %v626_v58 = vmul.f32 0.6931472, %v1022_v53  ;;  %1023 = vpow2.f32 %v478_v44  ;;  %v486_v41 = vmul.f32 1.442695, %v462_v39  ;;  %v682_v61 = vadd.f32 %v681_v43, %v660_v46 }
  0xc9   : > { %v623_v59 = vsel %vm1618_vm10, %v620_v32, %v617_v54  ;;  %1025 = vpow2.f32 %v480_v49  ;;  %v398_v23 = vmax.f32 %v1583_v48, 0.0  ;;  %v414_v21 = vmul.f32 %v369_v13, %v1599_v11  ;;  %v386_v13 = vld [vmem:[%s1554_s18 + $0x40] sm:$0xff] }
  0xca   : > { %v632_v56 = vsel %vm1627_vm11, %v629_v37, %v626_v58  ;;  %v646_v60 = vadd.f32 %v623_v59, %v1531_v38  ;;  %1027 = vpow2.f32 %v482_v55  ;;  %v415_v12 = vmul.f32 %v370_v14, %v1606_v17 }
  0xcb   : > { %v647_v52 = vadd.f32 %v632_v56, %v437_v34  ;;  %1029 = vpow2.f32 %v484_v57  ;;  %v399_v30 = vmax.f32 %v1599_v11, 0.0  ;;  %v400_v32 = vmax.f32 %v1606_v17, 0.0 }
  0xcc   : > { %v661_v7 = vmul.f32 %v646_v60, %v391_v50  ;;  %1031 = vpow2.f32 %v486_v41  ;;  %v401_v36 = vmax.f32 %v1609_v18, 0.0  ;;  %v402_v37 = vmax.f32 %v1612_v20, 0.0 }
  0xcd   : > { %v662_v8 = vmul.f32 %v647_v52, %v392_v47  ;;  %v416_v33 = vmul.f32 %v371_v26, %v1609_v18  ;;  %v417_v39 = vmul.f32 %v372_v29, %v1612_v20  ;;  %v428_v42 = vsub.f32 %v398_v23, %v413_v24  ;;  %v383_v47 = vld [vmem:[%s1554_s18 + $0x28] sm:$0xff] }
  0xce   : > { %v683_v62 = vadd.f32 %v682_v61, %v661_v7  ;;  %v429_v44 = vsub.f32 %v399_v30, %v414_v21  ;;  %v430_v58 = vsub.f32 %v400_v32, %v415_v12  ;;  %v384_v7 = vld [vmem:[%s1554_s18 + $0x30] sm:$0xff]  ;;  %v387_v24 = vld [vmem:[%s1554_s18 + $0x48] sm:$0xff] }
  0xcf   : > { %v684_v63 = vsel %vm669_vm6, %v662_v8, 0.0  ;;  %v431_v8 = vsub.f32 %v401_v36, %v416_v33  ;;  %v665_v36 = vld [vmem:[#allocation2 + $0x10] sm:$0xff] }
  0xd0   : > { %v685_v0 = vadd.f32 %v684_v63, %v683_v62 }
  0xd2   : > { %v1024_v1 = vpop.eup %1023  ;;  %686 = vadd.xlane.f32.xlu1 %v685_v0 }
  0xd3   : > { %v1026_v51 = vpop.eup %1025  ;;  %v543_v2 = vadd.f32 1.0, %v1024_v1  ;;  %v546_v10 = vmul.f32 -0.5, %v1024_v1  ;;  %v549_v31 = vand.u32 2147483647, %v1024_v1 }
  0xd4   : > { %v1028_v3 = vpop.eup %1027  ;;  %v552_v38 = vadd.f32 1.0, %v1026_v51  ;;  %v555_v15 = vmul.f32 -0.5, %v1026_v51  ;;  %v558_v48 = vand.u32 2147483647, %v1026_v51 }
  0xd5   : > { %v1642_v4 = vpop.eup %1029  ;;  %1033 = vlog2.f32 %v543_v2  ;;  %v561_v5 = vadd.f32 1.0, %v1028_v3  ;;  %v564_v22 = vmul.f32 -0.5, %v1028_v3  ;;  %v547_v27 = vadd.f32 1.0, %v546_v10 }
  0xd6   : > { %v1644_v6 = vpop.eup %1031  ;;  %1035 = vlog2.f32 %v552_v38  ;;  %v570_v16 = vadd.f32 1.0, %v1642_v4  ;;  %v573_v28 = vmul.f32 -0.5, %v1642_v4  ;;  %v556_v40 = vadd.f32 1.0, %v555_v15 }
  0xd7   : > { %1037 = vlog2.f32 %v561_v5  ;;  %v579_v25 = vadd.f32 1.0, %v1644_v6  ;;  %v565_v19 = vadd.f32 1.0, %v564_v22  ;;  %v582_v35 = vmul.f32 -0.5, %v1644_v6 }
  0xd8   : > { %1039 = vlog2.f32 %v570_v16  ;;  %v567_v45 = vand.u32 2147483647, %v1028_v3  ;;  %v548_v11 = vmul.f32 %v1024_v1, %v547_v27  ;;  %v574_v46 = vadd.f32 1.0, %v573_v28  ;;  %v385_v1 = vld [vmem:[%s1554_s18 + $0x38] sm:$0xff] }
  0xd9   : > { %1041 = vlog2.f32 %v579_v25  ;;  %vm1665_vm12 = vcmp.lt.f32.partialorder %v549_v31, 0.0004427343  ;;  %v557_v49 = vmul.f32 %v1026_v51, %v556_v40  ;;  %v576_v53 = vand.u32 2147483647, %v1642_v4  ;;  %v663_v40 = vld [vmem:[#allocation2] sm:$0xff] }
  0xda   : > { %vm1670_vm13 = vcmp.lt.f32.partialorder %v558_v48, 0.0004427343  ;;  %v566_v20 = vmul.f32 %v1028_v3, %v565_v19  ;;  %v583_v55 = vadd.f32 1.0, %v582_v35  ;;  %vm1674_vm14 = vcmp.lt.f32.partialorder %v567_v45, 0.0004427343 }
  0xdb   : > { %v585_v59 = vand.u32 2147483647, %v1644_v6  ;;  %v575_v61 = vmul.f32 %v1642_v4, %v574_v46  ;;  %vm1686_vm15 = vcmp.lt.f32.partialorder %v576_v53, 0.0004427343  ;;  %v432_v5 = vsub.f32 %v402_v37, %v417_v39 }
  0xdc   : > { %v584_v3 = vmul.f32 %v1644_v6, %v583_v55  ;;  %v1225_v31 = vmov 0  }
  0xdd   : > { %vm586_vm1 = vcmp.lt.f32.partialorder %v585_v59, 0.0004427343  ;;  %981 = vset.pattern.permute.xlu1 %v1225_v31  ;;  %982 = vset.pattern.permute.xlu0 %v1225_v31 }
  0xdf   : > { %v1034_v43 = vpop.eup %1033 }
  0xe0   : > { %v1036_v34 = vpop.eup %1035  ;;  %v545_v54 = vmul.f32 0.6931472, %v1034_v43 }
  0xe1   : > { %v1038_v57 = vpop.eup %1037  ;;  %v554_v41 = vmul.f32 0.6931472, %v1036_v34 }
  0xe2   : > { %v551_v56 = vsel %vm1665_vm12, %v548_v11, %v545_v54  ;;  %v563_v60 = vmul.f32 0.6931472, %v1038_v57  ;;  %v1040_v52 = vpop.eup %1039 }
  0xe3   : > { %v560_v62 = vsel %vm1670_vm13, %v557_v49, %v554_v41  ;;  %v638_v0 = vadd.f32 %v551_v56, %v428_v42  ;;  %v572_v2 = vmul.f32 0.6931472, %v1040_v52  ;;  %v1042_v4 = vpop.eup %1041  ;;  %v664_v42 = vld [vmem:[#allocation2 + $0x8] sm:$0xff] }
  0xe4   : > { %v569_v51 = vsel %vm1674_vm14, %v566_v20, %v563_v60  ;;  %v639_v38 = vadd.f32 %v560_v62, %v429_v44  ;;  %v581_v15 = vmul.f32 0.6931472, %v1042_v4 }
  0xe5   : > { %v640_v9 = vadd.f32 %v569_v51, %v430_v58  ;;  %v653_v10 = vmul.f32 %v638_v0, %v383_v47  ;;  %v578_v14 = vsel %vm1686_vm15, %v575_v61, %v572_v2 }
  0xe6   : > { %v654_v16 = vmul.f32 %v639_v38, %v384_v7  ;;  %v641_v22 = vadd.f32 %v578_v14, %v431_v8  ;;  %v587_v25 = vsel %vm586_vm1, %v584_v3, %v581_v15 }
  0xe7   : > { %v655_v23 = vmul.f32 %v640_v9, %v385_v1  ;;  %v642_v21 = vadd.f32 %v587_v25, %v432_v5 }
  0xe8   : > { %v674_v26 = vadd.f32 %v654_v16, %v653_v10  ;;  %v656_v12 = vmul.f32 %v641_v22, %v386_v13 }
  0xe9   : > { %v657_v27 = vmul.f32 %v642_v21, %v387_v24 }
  0xea   : > { %v675_v6 = vadd.f32 %v674_v26, %v655_v23 }
  0xeb   : > { %v677_v29 = vsel %vm669_vm6, %v657_v27, 0.0 }
  0xec   : > { %v676_v28 = vadd.f32 %v675_v6, %v656_v12 }
  0xee   : > { %v678_v30 = vadd.f32 %v677_v29, %v676_v28 }
  0xf0   : > { %679 = vadd.xlane.f32.xlu0 %v678_v30 }
 0x151   : > { %v673_v32 = vpop.xlane.xlu0 %672 }
 0x152   : > { %v688_v48 = vadd.f32 %v673_v32, %v663_v40 }
 0x154   : > { %692 = vst.msk [vmem:[#allocation2] sm:$0xff] %vm344_vm0, %v688_v48 }
 0x15b   : > { %v698_v19 = vld [vmem:[#allocation2] sm:$0xff] }
 0x15c   : > { %v701_v35 = vmul.f32 0.0016666667, %v698_v19 }
 0x15e   : > { %706 = vperm.xlu1 %981, %v701_v35  }
 0x15f   : > { %v687_v37 = vpop.xlane.xlu1 %686 }
 0x160   : > { %v690_v33 = vadd.f32 %v687_v37, %v665_v36 }
 0x162   : > { %694 = vst.msk [vmem:[#allocation2 + $0x10] sm:$0xff] %vm344_vm0, %v690_v33 }
 0x169   : > { %v700_v45 = vld [vmem:[#allocation2 + $0x10] sm:$0xff] }
 0x16a   : > { %v703_v39 = vmul.f32 0.0016666667, %v700_v45 }
 0x16c   : > { %716 = vperm.xlu1 %981, %v703_v39  }
 0x17d   : > { %v680_v11 = vpop.xlane.xlu0 %679 }
 0x17e   : > { %v689_v46 = vadd.f32 %v680_v11, %v664_v42 }
 0x180   : > { %693 = vst.msk [vmem:[#allocation2 + $0x8] sm:$0xff] %vm344_vm0, %v689_v46 }
 0x187   : > { %v699_v43 = vld [vmem:[#allocation2 + $0x8] sm:$0xff] }
 0x188   : > { %v702_v44 = vmul.f32 0.0016666667, %v699_v43 }
 0x18a   : > { %711 = vperm.xlu0 %982, %v702_v44  }
 0x1dd   : > { %v707_v17 = vpop.permute.xlu1 %706 }
 0x1de   : > { %719 = vst [vmem:[%s313_s29] sm:$0xff] %v707_v17 }
 0x1eb   : > { %v717_v49 = vpop.permute.xlu1 %716 }
 0x1ec   : > { %721 = vst [vmem:[%s313_s29 + $0x10] sm:$0xff] %v717_v49 }
 0x204   : > { %729 = sbr.rel (!%p1807_p8) target bundleno = 551 (0x227), region = 56 }
 0x209   : > { %v712_v53 = vpop.permute.xlu0 %711 }
 0x20a   : > { %720 = vst [vmem:[%s313_s29 + $0x8] sm:$0xff] %v712_v53 }
 0x20b   : > { %s1824_s9 = smov (!%p732_p4, %s731_s9), 3 }
 0x20c   : > { %s1707_s22 = sshll.u32 %s1824_s9, 7 }
 0x20d   : > { %s736_s10 = ssub.s32 384, %s1707_s22 }
 0x20e   : > { %737 = vsyncadd %s723_s5, %s736_s10  ;;  %p896_p0 = scmp.ne.s32.totalorder %s1707_s22, 0  ;;  %s902_s28 = smul.u32 384, %s1205_s15 }
 0x20f   : > { %s742_s25 = sshll.u32 %s313_s29, 4  ;;  %s1226_s7 = smov [#allocation9]   ;;  %s1719_s25 = int_to_ptr.vmem [resolvable:$true] %s742_s25 }
 0x210   : > { %s1717_s8 = scalar_lea.hbm %s1773_s3, %s902_s28  ;;  %s1127_s11 = scalar_lea.vmem %s1719_s25, %s1707_s22 }
 0x211   : > { %p1128_p10 = scmp.ne.s32.totalorder %s1719_s25, %s1127_s11  ;;  %s1131_s23 = sshll.u32 %s1226_s7, 4  ;;  %s1132_s23 = int_to_ptr.vmem [resolvable:$false] %s1131_s23 }
 0x212   : > { %s1133_s15 = scalar_lea.vmem %s1132_s23, 768  ;;  %p1134_p3 = scmp.lt.s32.totalorder %s1719_s25, %s1132_s23 }
 0x213   : > { %p1129_p13 = pnand %p1128_p10, %p896_p0  ;;  %p1135_p11 = scmp.lt.s32.totalorder %s1133_s15, %s1127_s11 }
 0x215   : > { %p1130_p1 = pneg %p1129_p13  ;;  %p1136_p2 = por %p1135_p11, %p1134_p3 }
 0x217   : > { %p1137_p6 = pnand %p1136_p2, %p1130_p1 }
 0x219   : > { %1140 = shalt.err (!%p1137_p6)
}
 0x21a   : > { %s1141_s19 = scalar_lea.hbm %s1717_s8, %s1707_s22  ;;  %s1145_s29 = scalar_lea.hbm %s1773_s3, 640 }
 0x21b   : > { %p1142_p7 = scmp.ne.s32.totalorder %s1717_s8, %s1141_s19  ;;  %p1146_p12 = scmp.lt.u32.totalorder %s1717_s8, %s1773_s3 }
 0x21c   : > { %p1147_p8 = scmp.lt.u32.totalorder %s1145_s29, %s1141_s19  ;;  %p1149_p10 = scmp.lt.u32.totalorder %s1141_s19, %s1717_s8 }
 0x21d   : > { %p1143_p5 = pnand %p1142_p7, %p896_p0 }
 0x21e   : > { %p1148_p4 = por %p1147_p8, %p1146_p12 }
 0x21f   : > { %p1144_p9 = pneg %p1143_p5 }
 0x220   : > { %p1150_p13 = por %p1149_p10, %p1148_p4 }
 0x222   : > { %p1151_p1 = pnand %p1150_p13, %p1144_p9 }
 0x224   : > { %1154 = shalt.err (!%p1151_p1)
}
 0x225   : > { %s1227_s10 = smov 128   ;;  %s1228_s28 = smov 8  }
 0x226   : > { %748 = dma.vmem_to_hbm [thread:$0]  (%p896_p0), %s1719_s25, %s1707_s22, %s1717_s8, %s723_s5, %s1227_s10, %s1227_s10, %s1228_s28  }
 0x227 PF: > { %s757_s30 = sand.u32 1, %s1193_s12   ;;  %p1808_p3 = scmp.ne.s32.totalorder %s1778_s27, 0 }
 0x228   : > { %p1809_p11 = scmp.ge.s32.totalorder %s1213_s17, 2  ;;  %s758_s6 = scalar_lea.sflag [#allocation5], %s757_s30 }
 0x22a   : > { %p916_p2 = pnand %p1809_p11, %p1808_p3 }
 0x22c   : > { %1188 = dma.done.wait (!%p916_p2), %s758_s6, 384  }
 0x22d   : > { %1190 = vsyncadd (!%p916_p2), %s758_s6, 4294966912  ;;  %s22_s17 = sadd.s32 1, %s1213_s17   ;;  %s1810_s12 = smov %s1197_s13 }
 0x22e   : > { %p19_p6 = scmp.ge.s32.totalorder %s22_s17, 4   ;;  %s1811_s13 = smov %s1201_s14 }
 0x22f   : > { %s1812_s14 = smov %s1309_s26  ;;  %s1813_s15 = smov %s1209_s16 }
 0x230   : > { %s1814_s16 = smov %s1816_s20  ;;  %21 = sbr.rel (!%p19_p6) target bundleno = 8 (0x8), region = 109 }
 0x237   :  { %763 = vsyncpa [#allocation4], 1 }
 0x238   :  { %765 = vsyncpa [#allocation4 + $0x1], 1 }
 0x239   :  { %766 = vsyncpa [#allocation7], 1 }
 0x23a   :  { %768 = vsyncpa [#allocation7 + $0x1], 1 }
 0x23b   :  { %769 = vsyncpa [#allocation5], 1 }
 0x23c   :  { %771 = vsyncpa [#allocation5 + $0x1], 1 }

</bundles_post_ra>
